<compile_context>
chip_gen: v7x
topology: tpu7x:2x2x1
jax: 0.10.0
libtpu: 0.0.40
codegen_flags: <defaults>
</compile_context>

<pallas_src>
import functools

import jax
import jax.numpy as jnp
from jax.experimental import pallas as pl
from jax.experimental.pallas import tpu as pltpu


# ---------------------------------------------------------------------------
# Kernels
# ---------------------------------------------------------------------------

def _gca_single_pass_kernel(x_ref, o_ref, *, c, eps, inv_hw):
    """Whole-image block(s): (TB, C, HW). One read + one write of x."""
    x = x_ref[...]                                               # input dtype

    # Global average pool over the spatial (lane) axis, f32 accumulation.
    y = jnp.sum(x, axis=-1, keepdims=True, dtype=jnp.float32) * inv_hw  # (TB, C, 1)

    # Per-image channel statistics (two-term variance: robust, always >= 0).
    mean = jnp.mean(y, axis=1, keepdims=True)                    # (TB, 1, 1)
    d = y - mean
    var = jnp.mean(d * d, axis=1, keepdims=True)

    y_norm = d * jax.lax.rsqrt(var + eps)                        # EUP rsqrt (free slot)
    y_t = jnp.exp((y_norm * y_norm) * (-0.5 * c))                # (TB, C, 1) f32

    # Broadcast multiply in the input dtype (no persistent f32 tile copy).
    o_ref[...] = x * y_t.astype(x.dtype)


def _gca_two_pass_kernel(x_ref, o_ref, acc_ref, yt_ref, *,
                         c, eps, hw, thw, n_t, mask_last):
    """Spatially tiled two-pass variant.

    grid = (B, 2, n_tiles); x/o blocks are (1, C, THW).
      pass 0 (p == 0): accumulate per-channel spatial sums into acc_ref (1, C, 1).
      pass 1 (p == 1): compute the gaussian channel gate once (t == 0), then
                       write x * gate for every spatial tile.
    """
    p = pl.program_id(1)
    t = pl.program_id(2)

    @pl.when(jnp.logical_and(p == 0, t == 0))
    def _init():
        acc_ref[...] = jnp.zeros_like(acc_ref)
        # Safety guard: the output block is pinned at tile 0 during pass 0;
        # give it well-defined contents so any spurious writeback stores real
        # data (it is overwritten with the gated values at p==1, t==0 anyway).
        o_ref[...] = x_ref[...]

    @pl.when(p == 0)
    def _accumulate():
        x = x_ref[...]                                           # (1, C, THW)
        if mask_last:
            # Only the final spatial tile is partial; mask only there.
            @pl.when(t == n_t - 1)
            def _masked():
                pos = jax.lax.broadcasted_iota(jnp.int32, x.shape, 2) + t * thw
                xm = jnp.where(pos < hw, x, jnp.zeros_like(x))
                acc_ref[...] += jnp.sum(xm, axis=-1, keepdims=True,
                                        dtype=jnp.float32)

            @pl.when(t != n_t - 1)
            def _full():
                acc_ref[...] += jnp.sum(x, axis=-1, keepdims=True,
                                        dtype=jnp.float32)
        else:
            acc_ref[...] += jnp.sum(x, axis=-1, keepdims=True,
                                    dtype=jnp.float32)

    @pl.when(jnp.logical_and(p == 1, t == 0))
    def _finalize_gate():
        y = acc_ref[...] * (1.0 / hw)                            # (1, C, 1)
        mean = jnp.mean(y, axis=1, keepdims=True)
        d = y - mean
        var = jnp.mean(d * d, axis=1, keepdims=True)
        y_norm = d * jax.lax.rsqrt(var + eps)
        yt_ref[...] = jnp.exp((y_norm * y_norm) * (-0.5 * c))

    @pl.when(p == 1)
    def _apply():
        x = x_ref[...]
        o_ref[...] = x * yt_ref[...].astype(x.dtype)


# ---------------------------------------------------------------------------
# Sizing helpers (all in PADDED (sublane, 128) VMEM bytes)
# ---------------------------------------------------------------------------

_HEADROOM_BYTES = 8 << 20          # temps / compiler scratch
_TARGET_BLOCK_BYTES = 6 << 20      # HBM-roofline sweet spot (~85%+ measured)


def _round_up(x, m):
    return -(-x // m) * m


def _sublane_count(dtype):
    # 8 for f32, 16 for bf16, 32 for int8/fp8.
    return max(8, 32 // jnp.dtype(dtype).itemsize)


def _chip_vmem_capacity_bytes():
    """Physical VMEM per core; conservative 64 MiB (v7x) if the query fails."""
    try:
        info = pltpu.get_tpu_info()
        cap = getattr(info, "vmem_capacity_bytes", None)
        if cap:
            return int(cap)
    except Exception:
        pass
    return 64 << 20


def _derive_budgets(vmem_block_budget):
    """Returns (per-block budget bytes, cap for vmem_limit_bytes)."""
    cap = _chip_vmem_capacity_bytes()
    # ~0.70 x VMEM, never above 96 MiB: ~44.8 MiB on v7x, ~89.6 MiB on v5e/v6e.
    vmem_limit_cap = max(int(0.70 * cap), 16 << 20)
    vmem_limit_cap = min(vmem_limit_cap, 96 << 20)
    if vmem_block_budget is None:
        vmem_block_budget = max(vmem_limit_cap - _HEADROOM_BYTES, 4 << 20)
    # in + out blocks, each double-buffered.
    budget_per_block = max(vmem_block_budget // 4, 1)
    return budget_per_block, vmem_limit_cap


def _vmem_limit_bytes(block_bytes, scratch_bytes, cap):
    need = 4 * block_bytes + scratch_bytes + _HEADROOM_BYTES
    return int(min(max(need, 16 << 20), cap))


def _pick_batch_tile(batch, image_bytes, budget_per_block):
    """Pick TB for the single-pass path.

    Targets ~_TARGET_BLOCK_BYTES blocks (within budget), allows non-divisor
    TB (cdiv grid; per-image math is independent, OOB writes are dropped),
    and keeps >= 4 grid steps with an even count when possible so both v7x
    TensorCores get overlapped work.
    """
    tb = min(batch,
             max(1, budget_per_block // max(image_bytes, 1)),
             max(1, _TARGET_BLOCK_BYTES // max(image_bytes, 1)))
    # Keep enough grid steps for in-DMA/compute/out-DMA overlap per core.
    while tb > 1 and pl.cdiv(batch, tb) < 4:
        tb -= 1
    # Prefer an even step count (v7x megacore tail balance), small penalty only.
    if tb > 1:
        steps = pl.cdiv(batch, tb)
        if steps >= 4 and steps % 2 == 1:
            for cand in range(tb - 1, max(tb // 2, 1) - 1, -1):
                if pl.cdiv(batch, cand) % 2 == 0:
                    tb = cand
                    break
    return tb


# ---------------------------------------------------------------------------
# Wrapper
# ---------------------------------------------------------------------------

def gca_forward(x, c=2, eps=1e-5, *, vmem_block_budget=None):
    """x: (B, C, H, W) float array. Returns array of same shape/dtype."""
    B, C, H, W = x.shape
    HW = H * W
    dtype = x.dtype
    itemsize = jnp.dtype(dtype).itemsize
    x_flat = x.reshape(B, C, HW)

    # True VMEM footprint of one image's block: (sublane, 128)-padded.
    padded_c = _round_up(C, _sublane_count(dtype))
    padded_hw = _round_up(HW, 128)
    image_bytes = padded_c * padded_hw * itemsize

    budget_per_block, vmem_cap = _derive_budgets(vmem_block_budget)

    if image_bytes <= budget_per_block:
        # ---- single-pass path: whole image(s) resident per grid step -------
        tb = _pick_batch_tile(B, image_bytes, budget_per_block)
        n_steps = pl.cdiv(B, tb)
        block_bytes = tb * image_bytes
        kernel = functools.partial(
            _gca_single_pass_kernel,
            c=float(c), eps=float(eps), inv_hw=1.0 / float(HW))
        cost = pl.CostEstimate(
            flops=4 * B * C * HW,
            transcendentals=B * C,
            bytes_accessed=2 * B * C * HW * itemsize)
        out_flat = pl.pallas_call(
            kernel,
            out_shape=jax.ShapeDtypeStruct((B, C, HW), dtype),
            grid_spec=pltpu.PrefetchScalarGridSpec(
                num_scalar_prefetch=0,
                grid=(n_steps,),
                in_specs=[pl.BlockSpec((tb, C, HW), lambda b: (b, 0, 0))],
                out_specs=pl.BlockSpec((tb, C, HW), lambda b: (b, 0, 0)),
            ),
            compiler_params=pltpu.CompilerParams(
                dimension_semantics=("parallel",),
                vmem_limit_bytes=_vmem_limit_bytes(block_bytes, 0, vmem_cap),
            ),
            cost_estimate=cost,
        )(x_flat)
    else:
        # ---- two-pass spatially-tiled fallback (image too big for VMEM) ----
        lane_bytes = padded_c * 128 * itemsize         # one 128-lane column
        thw = max(128, (budget_per_block // max(lane_bytes, 1)) * 128)
        thw = min(thw, padded_hw)
        n_t = pl.cdiv(HW, thw)
        mask_last = (HW % thw) != 0
        block_bytes = padded_c * thw * itemsize
        scratch_bytes = 2 * _round_up(C, 8) * 128 * 4  # two (1,C,1) f32 pads
        kernel = functools.partial(
            _gca_two_pass_kernel,
            c=float(c), eps=float(eps), hw=HW, thw=thw,
            n_t=n_t, mask_last=mask_last)
        cost = pl.CostEstimate(
            flops=3 * B * C * HW,
            transcendentals=B * C,
            bytes_accessed=3 * B * C * HW * itemsize)
        out_flat = pl.pallas_call(
            kernel,
            out_shape=jax.ShapeDtypeStruct((B, C, HW), dtype),
            grid_spec=pltpu.PrefetchScalarGridSpec(
                num_scalar_prefetch=0,
                grid=(B, 2, n_t),
                in_specs=[pl.BlockSpec((1, C, thw), lambda b, p, t: (b, 0, t))],
                # Pin the output block to tile 0 during pass 0; pass 1 visits
                # and writes every tile.
                out_specs=pl.BlockSpec((1, C, thw), lambda b, p, t: (b, 0, t * p)),
                scratch_shapes=[
                    pltpu.VMEM((1, C, 1), jnp.float32),   # per-channel sums
                    pltpu.VMEM((1, C, 1), jnp.float32),   # gaussian gate
                ],
            ),
            compiler_params=pltpu.CompilerParams(
                dimension_semantics=("parallel", "arbitrary", "arbitrary"),
                vmem_limit_bytes=_vmem_limit_bytes(block_bytes, scratch_bytes,
                                                   vmem_cap),
            ),
            cost_estimate=cost,
        )(x_flat)

    return out_flat.reshape(B, C, H, W)


def gca_reference(x, c=2, eps=1e-5):
    """Pure-JAX reference mirroring the PyTorch forward, for validation."""
    y = jnp.mean(x, axis=(2, 3), keepdims=True)                  # (B, C, 1, 1)
    mean = jnp.mean(y, axis=1, keepdims=True)
    mean_x2 = jnp.mean(y * y, axis=1, keepdims=True)
    var = mean_x2 - mean * mean
    y_norm = (y - mean) / jnp.sqrt(var + eps)
    y_transform = jnp.exp(-(y_norm ** 2 / 2 * c))
    return x * y_transform


if __name__ == "__main__":
    # 1) Small shape consistent with the module -> single-pass path, tb=1.
    key = jax.random.PRNGKey(0)
    B, C, H, W = 2, 4, 16, 16
    x = jax.random.normal(key, (B, C, H, W), dtype=jnp.float32)
    out = jax.block_until_ready(gca_forward(x, c=2, eps=1e-5))
    ref = gca_reference(x, c=2, eps=1e-5)
    assert out.shape == x.shape and out.dtype == x.dtype
    assert jnp.allclose(out, ref, atol=1e-5, rtol=1e-5), "single-pass mismatch"

    # 2) Non-divisor batch tiling (B=7 -> tb=2, ragged last batch block).
    x2 = jax.random.normal(jax.random.PRNGKey(0), (7, 8, 16, 16), dtype=jnp.float32)
    out2 = jax.block_until_ready(gca_forward(x2, c=2, eps=1e-5))
    ref2 = gca_reference(x2, c=2, eps=1e-5)
    assert jnp.allclose(out2, ref2, atol=1e-5, rtol=1e-5), "ragged-batch mismatch"

    # 3) Exercise the two-pass spatially-tiled fallback (forced via a tiny
    #    VMEM block budget), including a masked partial last spatial tile
    #    (HW = 384, THW = 256 -> tiles [0,256) and [256,384)).
    x3 = jax.random.normal(jax.random.PRNGKey(0), (2, 8, 16, 24), dtype=jnp.float32)
    out3 = jax.block_until_ready(
        gca_forward(x3, c=2, eps=1e-5, vmem_block_budget=32 * 1024))
    ref3 = gca_reference(x3, c=2, eps=1e-5)
    assert out3.shape == x3.shape and out3.dtype == x3.dtype
    assert jnp.allclose(out3, ref3, atol=1e-5, rtol=1e-5), "two-pass mismatch"

    # 4) bf16 input (checks 16-sublane padding accounting + input-dtype multiply).
    x4 = jax.random.normal(jax.random.PRNGKey(0), (2, 4, 16, 16),
                           dtype=jnp.bfloat16)
    out4 = jax.block_until_ready(gca_forward(x4, c=2, eps=1e-5))
    ref4 = gca_reference(x4.astype(jnp.float32), c=2, eps=1e-5).astype(jnp.bfloat16)
    assert out4.dtype == jnp.bfloat16
    assert jnp.allclose(out4.astype(jnp.float32), ref4.astype(jnp.float32),
                        atol=2e-2, rtol=2e-2), "bf16 mismatch"

    print("KERNEL_OK")
</pallas_src>

<mosaic_0001>
module attributes {stable_mosaic.version = 11 : i64} {
  func.func @_gca_single_pass_kernel(%arg0: i32, %arg1: memref<1x4x256xf32, #tpu.memory_space<vmem>>, %arg2: memref<1x4x256xf32, #tpu.memory_space<vmem>>) attributes {dimension_semantics = [#tpu.dimension_semantics<parallel>], iteration_bounds = array<i64: 2>, scalar_prefetch = 0 : i64, scratch_operands = 0 : i64, tpu.core_type = #tpu.core_type<tc>, window_params = [{transform_indices = @transform_0, window_bounds = array<i64: 1, 4, 256>}, {transform_indices = @transform_1, window_bounds = array<i64: 1, 4, 256>}]} {
    %c0 = arith.constant 0 : index
    %c0_0 = arith.constant 0 : index
    %c0_1 = arith.constant 0 : index
    %0 = vector.load %arg1[%c0, %c0_0, %c0_1] : memref<1x4x256xf32, #tpu.memory_space<vmem>>, vector<1x4x256xf32>
    %cst = arith.constant dense<0.000000e+00> : vector<1x4xf32>
    %1 = vector.multi_reduction <add>, %0, %cst [2] : vector<1x4x256xf32> to vector<1x4xf32>
    %2 = vector.shape_cast %1 : vector<1x4xf32> to vector<1x4x1xf32>
    %cst_2 = arith.constant 3.906250e-03 : f32
    %3 = vector.broadcast %cst_2 : f32 to vector<1x4x1xf32>
    %4 = arith.mulf %2, %3 : vector<1x4x1xf32>
    %cst_3 = arith.constant dense<0.000000e+00> : vector<1x1xf32>
    %5 = vector.multi_reduction <add>, %4, %cst_3 [1] : vector<1x4x1xf32> to vector<1x1xf32>
    %6 = vector.shape_cast %5 : vector<1x1xf32> to vector<1x1x1xf32>
    %cst_4 = arith.constant 4.000000e+00 : f32
    %7 = vector.broadcast %cst_4 : f32 to vector<1x1x1xf32>
    %8 = arith.divf %6, %7 : vector<1x1x1xf32>
    %9 = vector.broadcast %8 : vector<1x1x1xf32> to vector<1x4x1xf32>
    %10 = arith.subf %4, %9 : vector<1x4x1xf32>
    %11 = arith.mulf %10, %10 : vector<1x4x1xf32>
    %cst_5 = arith.constant dense<0.000000e+00> : vector<1x1xf32>
    %12 = vector.multi_reduction <add>, %11, %cst_5 [1] : vector<1x4x1xf32> to vector<1x1xf32>
    %13 = vector.shape_cast %12 : vector<1x1xf32> to vector<1x1x1xf32>
    %cst_6 = arith.constant 4.000000e+00 : f32
    %14 = vector.broadcast %cst_6 : f32 to vector<1x1x1xf32>
    %15 = arith.divf %13, %14 : vector<1x1x1xf32>
    %cst_7 = arith.constant 9.99999974E-6 : f32
    %16 = vector.broadcast %cst_7 : f32 to vector<1x1x1xf32>
    %17 = arith.addf %15, %16 : vector<1x1x1xf32>
    %18 = math.rsqrt %17 : vector<1x1x1xf32>
    %19 = vector.broadcast %18 : vector<1x1x1xf32> to vector<1x4x1xf32>
    %20 = arith.mulf %10, %19 : vector<1x4x1xf32>
    %21 = arith.mulf %20, %20 : vector<1x4x1xf32>
    %cst_8 = arith.constant -1.000000e+00 : f32
    %22 = vector.broadcast %cst_8 : f32 to vector<1x4x1xf32>
    %23 = arith.mulf %21, %22 : vector<1x4x1xf32>
    %24 = math.exp %23 : vector<1x4x1xf32>
    %25 = vector.broadcast %24 : vector<1x4x1xf32> to vector<1x4x256xf32>
    %26 = arith.mulf %0, %25 : vector<1x4x256xf32>
    %c0_9 = arith.constant 0 : index
    %c0_10 = arith.constant 0 : index
    %c0_11 = arith.constant 0 : index
    %27 = vector.load %arg2[%c0_9, %c0_10, %c0_11] : memref<1x4x256xf32, #tpu.memory_space<vmem>>, vector<1x4x256xf32>
    tpu.vector_store %arg2[%c0_9, %c0_10, %c0_11], %26 {strides = array<i32>} : memref<1x4x256xf32, #tpu.memory_space<vmem>>, vector<1x4x256xf32>,
    return
  }
  func.func @transform_0(%arg0: i32) -> (i32, i32, i32) {
    %c0_i32 = arith.constant 0 : i32
    %c0_i32_0 = arith.constant 0 : i32
    %c0_i32_1 = arith.constant 0 : i32
    return %arg0, %c0_i32, %c0_i32_0 : i32, i32, i32
  }
  func.func @transform_1(%arg0: i32) -> (i32, i32, i32) {
    %c0_i32 = arith.constant 0 : i32
    %c0_i32_0 = arith.constant 0 : i32
    %c0_i32_1 = arith.constant 0 : i32
    return %arg0, %c0_i32, %c0_i32_0 : i32, i32, i32
  }
}

</mosaic_0001>

<bundles_post_ra>
// kernel: tpu_custom_call.1
= control target key start
LH: loop header
LB: loop body
LE: loop exit
PB: predicated region body
PF: predicated region fallthrough
CT: control target
= control target key end

     0   :  { %6 = vsyncpa [#allocation3], 0  ;;  %s614_s0 = inlined_call_operand.hbm [shape: f32[2,4,256], index: 0, kind: input, shape index: {}]   ;;  %s615_s1 = inlined_call_operand.hbm [shape: f32[2,4,256], index: 1, kind: output, shape index: {}]  }
   0x1   :  { %8 = vsyncpa [#allocation3 + $0x1], 0 }
   0x2   :  { %9 = vsyncpa [#allocation4], 0 }
   0x3   :  { %11 = vsyncpa [#allocation4 + $0x1], 0  ;;  %s445_s6 = smov 0   ;;  %s447_s7 = smov 0  }
   0x4   :  { %s449_s8 = smov 0   ;;  %s451_s9 = smov 0  }
   0x5 LB: > { %s466_s10 = sadd.s32 4294967295, %s430_s9   ;;  %s266_s11 = sadd.s32 4294967294, %s430_s9   ;;  %s430_s9 = sphi %s451_s9, %s630_s9   ;;  %s426_s8 = sphi %s449_s8, %s629_s8   ;;  %s422_s7 = sphi %s447_s7, %s628_s7   ;;  %s418_s6 = sphi %s445_s6, %s627_s6  }
   0x6   : > { %s470_s12 = sadd.s32 1, %s430_s9   ;;  %s24_s13 = sadd.s32 1, %s426_s8 }
   0x7   : > { %s21_s14 = ssub.s32 %s430_s9, %s470_s12  ;;  %p31_p0 = scmp.ne.s32.totalorder %s426_s8, %s422_s7 }
   0x8   : > { %p22_p1 = scmp.eq.s32.totalorder %s21_s14, 0  ;;  %p32_p2 = scmp.eq.s32.totalorder %s430_s9, 0 }
   0x9   : > { %p37_p3 = scmp.ne.s32.totalorder %s422_s7, %s418_s6  ;;  %p38_p4 = scmp.eq.s32.totalorder %s466_s10, 0 }
   0xa   : > { %s482_s15 = scalar_select %p22_p1, %s426_s8, %s24_s13  }
   0xb   : > { %p484_p5 = por %p32_p2, %p31_p0  ;;  %p488_p6 = por %p38_p4, %p37_p3 }
   0xc   : > { %p61_p7 = scmp.eq.s32.totalorder %s466_s10, 1  ;;  %p67_p8 = scmp.eq.s32.totalorder %s266_s11, 1 }
   0xd   : > { %p294_p10 = scmp.lt.s32.totalorder %s430_s9, 2  ;;  %s87_s20 = sand.u32 1, %s426_s8  }
   0xe   : > { %p495_p11 = por %p61_p7, %p31_p0  ;;  %p499_p12 = por %p67_p8, %p37_p3 }
   0xf   : > { %s280_s21 = sshll.u32 %s430_s9, 7  ;;  %s269_s22 = sshll.u32 %s87_s20, 3 }
  0x10   : > { %s619_s18 = scalar_select %p495_p11, 1, 0 }
  0x11   : > { %s620_s19 = scalar_select %p499_p12, 1, 0 }
  0x12   : > { %s508_s25 = scalar_lea.hbm %s614_s0, %s280_s21  ;;  %s91_s26 = scalar_lea.vmem [#allocation2], %s269_s22 }
  0x13   : > { %s99_s27 = sshll.u32 %s91_s26, 4  ;;  %p512_p13 = pnand %p294_p10, %p484_p5  ;;  %s516_s27 = int_to_ptr.vmem [resolvable:$true] %s99_s27 }
  0x14   : > { %s88_s29 = scalar_lea.sflag [#allocation3], %s87_s20  ;;  %s334_s30 = scalar_lea.hbm %s508_s25, 128 }
  0x15   : > { %p335_p2 = scmp.ne.s32.totalorder %s508_s25, %s334_s30  ;;  %p336_p3 = pneg %p512_p13 }
  0x16   : > { %s339_s4 = scalar_lea.hbm %s614_s0, 256  ;;  %p340_p5 = scmp.lt.u32.totalorder %s508_s25, %s614_s0 }
  0x17   : > { %p337_p4 = pnand %p336_p3, %p335_p2  ;;  %p341_p8 = scmp.lt.u32.totalorder %s339_s4, %s334_s30 }
  0x18   : > { %p343_p9 = scmp.lt.u32.totalorder %s334_s30, %s508_s25 }
  0x19   : > { %p338_p7 = pneg %p337_p4  ;;  %p342_p10 = por %p341_p8, %p340_p5 }
  0x1b   : > { %p344_p0 = por %p343_p9, %p342_p10 }
  0x1d   : > { %p345_p1 = pnand %p344_p0, %p338_p7 }
  0x1f   : > { %348 = shalt.err (!%p345_p1)
}
  0x20   : > { %s349_s13 = scalar_lea.vmem %s516_s27, 128  ;;  %s432_s14 = smov [#allocation2]  }
  0x21   : > { %p350_p2 = scmp.ne.s32.totalorder %s516_s27, %s349_s13  ;;  %s354_s16 = sshll.u32 %s432_s14, 4  ;;  %s355_s16 = int_to_ptr.vmem [resolvable:$false] %s354_s16 }
  0x22   : > { %s356_s20 = scalar_lea.vmem %s355_s16, 256  ;;  %p357_p11 = scmp.lt.s32.totalorder %s516_s27, %s355_s16 }
  0x23   : > { %p352_p4 = pnand %p350_p2, %p336_p3  ;;  %p358_p5 = scmp.lt.s32.totalorder %s356_s20, %s349_s13 }
  0x25   : > { %p353_p12 = pneg %p352_p4  ;;  %p359_p8 = por %p358_p5, %p357_p11 }
  0x27   : > { %p360_p9 = pnand %p359_p8, %p353_p12 }
  0x29   : > { %363 = shalt.err (!%p360_p9)
}
  0x2a   : > { %289 = dma.hbm_to_vmem [thread:$0]  (!%p512_p13), %s508_s25, 128, %s516_s27, %s88_s29  }
  0x2b   : > { %p622_p0 = scmp.lt.s32.totalorder %s430_s9, 3  ;;  %p623_p1 = scmp.ge.s32.totalorder %s430_s9, 1 }
  0x2d   : > { %p105_p3 = pnand %p623_p1, %p622_p0 }
  0x2e   : > { %s550_s21 = sand.u32 (!%p105_p3), 1, %s422_s7  }
  0x2f   : > { %108 = sbr.rel (%p105_p3) target bundleno = 289 (0x121), region = 24  ;;  %s273_s22 = sshll.u32 (!%p105_p3), %s550_s21, 3 }
  0x30   : > { %s111_s23 = scalar_lea.sflag (!%p105_p3), [#allocation3], %s550_s21  ;;  %s114_s24 = scalar_lea.vmem (!%p105_p3), [#allocation2], %s273_s22 }
  0x36   : > { %409 = dma.done.wait (%p488_p6), %s111_s23, 128  }
  0x37   : > { %411 = vsyncadd (%p488_p6), %s111_s23, 4294967168  ;;  %vm137_vm0 = vcmask 1043456   ;;  %v133_v0 = vld [vmem:[%s114_s24] sm:$0xff]  ;;  %v433_v31 = vmov 839922192   ;;  %v174_v33 = vlaneseq  ;;  %s281_s17 = sshll.u32 %s466_s10, 7 }
  0x38   : > { %v135_v1 = vcombine.high %v133_v0, %v133_v0  ;;  %v138_v2 = vsel %vm137_vm0, %v133_v0, 0.0  ;;  %v172_v32 = vunpack.c.l.s4 %v433_v31  ;;  %s132_s25 = scalar_lea.vmem [#allocation5], %s273_s22  ;;  %s570_s29 = scalar_lea.hbm %s615_s1, %s281_s17 }
  0x39   : > { %v175_v35 = vshrl.u32 %v174_v33, 7  ;;  %s196_s26 = sshll.u32 %s132_s25, 4  ;;  %s182_s30 = scalar_lea.sflag [#allocation4], %s550_s21  ;;  %s572_s26 = int_to_ptr.vmem [resolvable:$true] %s196_s26 }
  0x3a   : > { %v139_v3 = vsel %vm137_vm0, %v135_v1, 0.0  ;;  %v173_v34 = vunpack.c.0.s8 %v172_v32  ;;  %s364_s2 = scalar_lea.vmem %s572_s26, 128  ;;  %p624_p11 = scmp.ne.s32.totalorder %s619_s18, 0 }
  0x3b   : > { %v140_v4 = vadd.f32 %v139_v3, %v138_v2  ;;  %p365_p6 = scmp.ne.s32.totalorder %s572_s26, %s364_s2  ;;  %s434_s10 = smov [#allocation5]  }
  0x3c   : > { %v176_v36 = vsub.s32 %v173_v34, %v175_v35  ;;  %s368_s3 = sshll.u32 %s434_s10, 4  ;;  %s369_s3 = int_to_ptr.vmem [resolvable:$false] %s368_s3 }
  0x3d   : > { %141 = vadd.xlane.f32.xlu0 %v140_v4  ;;  %p366_p12 = pnand %p365_p6, %p624_p11  ;;  %s370_s4 = scalar_lea.vmem %s369_s3, 256 }
  0x3e   : > { %p371_p7 = scmp.lt.s32.totalorder %s572_s26, %s369_s3  ;;  %p372_p10 = scmp.lt.s32.totalorder %s370_s4, %s364_s2 }
  0x3f   : > { %p367_p13 = pneg %p366_p12 }
  0x40   : > { %p373_p2 = por %p372_p10, %p371_p7 }
  0x42   : > { %p374_p4 = pnand %p373_p2, %p367_p13 }
  0xca   : > { %v142_v5 = vpop.xlane.xlu0 %141 }
  0xcb   : > { %v143_v6 = vmul.f32 0.00390625, %v142_v5 }
  0xcd   : > { %v144_v7 = vsel %vm137_vm0, %v143_v6, 0.0 }
  0xce   : > { %v145_v8 = vrot.slane %v144_v7, 4 }
  0xd0   : > { %v146_v9 = vadd.f32 %v145_v8, %v144_v7 }
  0xd2   : > { %v147_v10 = vrot.slane %v146_v9, 2 }
  0xd4   : > { %v148_v11 = vadd.f32 %v147_v10, %v146_v9 }
  0xd6   : > { %v149_v12 = vrot.slane %v148_v11, 1 }
  0xd8   : > { %v150_v13 = vadd.f32 %v149_v12, %v148_v11 }
  0xda   : > { %v152_v14 = vmul.f32 0.25, %v150_v13 }
  0xdc   : > { %v153_v15 = vsub.f32 %v143_v6, %v152_v14 }
  0xde   : > { %v154_v16 = vmul.f32 %v153_v15, %v153_v15 }
  0xe0   : > { %v155_v17 = vsel %vm137_vm0, %v154_v16, 0.0 }
  0xe1   : > { %v156_v18 = vrot.slane %v155_v17, 4 }
  0xe3   : > { %v157_v19 = vadd.f32 %v156_v18, %v155_v17 }
  0xe5   : > { %v158_v20 = vrot.slane %v157_v19, 2 }
  0xe7   : > { %v159_v21 = vadd.f32 %v158_v20, %v157_v19 }
  0xe9   : > { %v160_v22 = vrot.slane %v159_v21, 1 }
  0xeb   : > { %v161_v23 = vadd.f32 %v160_v22, %v159_v21 }
  0xed   : > { %v162_v24 = vmul.f32 0.25, %v161_v23 }
  0xef   : > { %v163_v25 = vadd.f32 1e-05, %v162_v24 }
  0xf1   : > { %330 = vrsqrt.f32 %v163_v25 }
  0xfb   : > { %v331_v26 = vpop.eup %330 }
  0xfc   : > { %v165_v27 = vmul.f32 %v331_v26, %v153_v15 }
  0xfe   : > { %v166_v28 = vmul.f32 %v165_v27, %v165_v27 }
 0x100   : > { %v167_v29 = vmul.f32 -1.0, %v166_v28 }
 0x102   : > { %v168_v30 = vmul.f32 1.442695, %v167_v29 }
 0x104   : > { %332 = vpow2.f32 %v168_v30 }
 0x10e   : > { %v333_v37 = vpop.eup %332 }
 0x10f   : > { %v177_v38 = vrot.slane %v333_v37, %v176_v36 }
 0x111   : > { %v179_v39 = vmul.f32 %v177_v38, %v133_v0 }
 0x113   : > { %180 = vst [vmem:[%s132_s25] sm:$0xff] %v179_v39 }
 0x114   : > { %377 = shalt.err (!%p374_p4)
}
 0x115   : > { %s378_s5 = scalar_lea.hbm %s570_s29, 128  ;;  %s382_s14 = scalar_lea.hbm %s615_s1, 256 }
 0x116   : > { %p379_p5 = scmp.ne.s32.totalorder %s570_s29, %s378_s5  ;;  %p383_p0 = scmp.lt.u32.totalorder %s570_s29, %s615_s1 }
 0x117   : > { %p384_p1 = scmp.lt.u32.totalorder %s382_s14, %s378_s5  ;;  %p386_p6 = scmp.lt.u32.totalorder %s378_s5, %s570_s29 }
 0x118   : > { %p380_p8 = pnand %p379_p5, %p624_p11 }
 0x119   : > { %p385_p3 = por %p384_p1, %p383_p0 }
 0x11a   : > { %p381_p9 = pneg %p380_p8 }
 0x11b   : > { %p387_p12 = por %p386_p6, %p385_p3 }
 0x11d   : > { %p388_p13 = pnand %p387_p12, %p381_p9 }
 0x11f   : > { %391 = shalt.err (!%p388_p13)
}
 0x120   : > { %284 = dma.vmem_to_hbm [thread:$0]  (%p624_p11), %s572_s26, 128, %s570_s29, %s182_s30  }
 0x121 PF: > { %s208_s21 = sand.u32 1, %s418_s6   ;;  %p625_p7 = scmp.ne.s32.totalorder %s620_s19, 0 }
 0x122   : > { %p626_p10 = scmp.ge.s32.totalorder %s430_s9, 2  ;;  %s209_s22 = scalar_lea.sflag [#allocation4], %s208_s21 }
 0x124   : > { %p291_p2 = pnand %p626_p10, %p625_p7 }
 0x126   : > { %413 = dma.done.wait (!%p291_p2), %s209_s22, 128  }
 0x127   : > { %415 = vsyncadd (!%p291_p2), %s209_s22, 4294967168  ;;  %p14_p4 = scmp.ge.s32.totalorder %s470_s12, 4   ;;  %s627_s6 = smov %s422_s7 }
 0x128   : > { %s628_s7 = smov %s426_s8  ;;  %s629_s8 = smov %s482_s15 }
 0x129   : > { %s630_s9 = smov %s470_s12  ;;  %16 = sbr.rel (!%p14_p4) target bundleno = 5 (0x5), region = 69 }
 0x130   :  { %214 = vsyncpa [#allocation3], 1 }
 0x131   :  { %216 = vsyncpa [#allocation3 + $0x1], 1 }
 0x132   :  { %217 = vsyncpa [#allocation4], 1 }
 0x133   :  { %219 = vsyncpa [#allocation4 + $0x1], 1 }

</bundles_post_ra>
